<compile_context>
chip_gen: v5e
topology: v5e:2x2
jax: 0.10.0
libtpu: 0.0.40
codegen_flags: <defaults>
</compile_context>

<pallas_src>
import functools

import jax
import jax.numpy as jnp
from jax import lax
from jax.experimental import pallas as pl
from jax.experimental.pallas import tpu as pltpu


ALPHA = 1.0
GAMMA = 2                 # fixed to 2 -> explicit square below (exact, no pow)

LANES = 128
ROW_ELEMS = 8 * LANES     # 1024 elements = one f32 vreg worth of rows
MAX_BLOCK_ROWS = 8192     # (8192,128) f32 tile = 4 MiB; 2 inputs x 2 bufs = 16 MiB
NUM_PARALLEL_CHUNKS = 2   # megacore-friendly leading grid axis (v7x); harmless 1-TC


def _focal_terms(p, t, binary_targets=False):
    """Elementwise focal term with PyTorch BCELoss(-100 log clamp) semantics."""
    p = p.astype(jnp.float32)
    t = t.astype(jnp.float32)
    if binary_targets:
        # 1 transcendental / element.  Only valid for hard labels t in {0,1}.
        z = jnp.where(t >= 0.5, p, 1.0 - p)
        bce = -jnp.maximum(jnp.log(z), jnp.float32(-100.0))
        pt = jnp.maximum(z, jnp.float32(3.720076e-44))     # ~= exp(-100)
    else:
        log_p = jnp.maximum(jnp.log(p), jnp.float32(-100.0))
        log_1mp = jnp.maximum(jnp.log(1.0 - p), jnp.float32(-100.0))
        bce = -(t * log_p + (1.0 - t) * log_1mp)
        pt = jnp.exp(-bce)
    one_minus_pt = 1.0 - pt
    focal = one_minus_pt * one_minus_pt * bce               # gamma == 2, exact
    if ALPHA != 1.0:
        focal = jnp.float32(ALPHA) * focal
    return focal


def _focal_sum_kernel(x_ref, t_ref, out_ref, acc_ref, *,
                      total_rows, block_rows, g_red, binary_targets):
    c = pl.program_id(0)          # parallel chunk (megacore axis)
    i = pl.program_id(1)          # reduction step within the chunk

    @pl.when(i == 0)
    def _():
        acc_ref[...] = jnp.zeros_like(acc_ref)

    block_idx = c * g_red + i                 # logical (unclamped) block index
    row_start = block_idx * block_rows
    is_full = (row_start + block_rows) <= total_rows

    def accumulate(p, t):
        focal = _focal_terms(p, t, binary_targets)
        # Fold the whole tile into one vreg: sublane-group sum (pure VALU).
        acc_ref[...] += focal.reshape(block_rows // 8, 8, LANES).sum(axis=0)

    @pl.when(is_full)
    def _():
        accumulate(x_ref[...], t_ref[...])

    @pl.when(jnp.logical_not(is_full))
    def _():
        # Partial trailing block (or clamped duplicate block): mask whole rows
        # past the valid row count.  Masked inputs -> p=1, t=1 -> focal == 0.
        row_ids = lax.broadcasted_iota(jnp.int32, (block_rows, LANES), 0)
        mask = (row_start + row_ids) < total_rows
        p = jnp.where(mask, x_ref[...].astype(jnp.float32), jnp.float32(1.0))
        t = jnp.where(mask, t_ref[...].astype(jnp.float32), jnp.float32(1.0))
        accumulate(p, t)

    @pl.when(i == pl.num_programs(1) - 1)
    def _():
        out_ref[...] = acc_ref[...]


@functools.partial(jax.jit, static_argnames=("binary_targets",))
def focal_loss(inputs, targets, *, binary_targets=False):
    """inputs, targets: same-shape float arrays (probabilities / labels)."""
    x = inputs.reshape(-1)
    t = targets.reshape(-1)
    # Keep native floating dtype (f32 / bf16); only promote non-float labels.
    if not jnp.issubdtype(x.dtype, jnp.floating):
        x = x.astype(jnp.float32)
    if not jnp.issubdtype(t.dtype, jnp.floating):
        t = t.astype(jnp.float32)
    n = int(x.shape[0])

    # Kernel streams the 1024-aligned prefix; the tiny tail is done in jnp.
    n_main = (n // ROW_ELEMS) * ROW_ELEMS
    total = jnp.float32(0.0)

    if n_main > 0:
        rows = n_main // LANES                       # multiple of 8
        x2 = x[:n_main].reshape(rows, LANES)
        t2 = t[:n_main].reshape(rows, LANES)

        block_rows = min(MAX_BLOCK_ROWS, rows)       # multiple of 8
        num_blocks = pl.cdiv(rows, block_rows)
        g_par = min(NUM_PARALLEL_CHUNKS, num_blocks)
        g_red = pl.cdiv(num_blocks, g_par)

        def in_map(c, i):
            # Clamp so the DMA'd block index is always in range; clamped
            # duplicate blocks are fully masked in-kernel (contribute 0).
            return (jnp.minimum(c * g_red + i, num_blocks - 1), 0)

        kernel = functools.partial(
            _focal_sum_kernel,
            total_rows=rows, block_rows=block_rows, g_red=g_red,
            binary_targets=binary_targets)

        tile_bytes = block_rows * LANES * (x2.dtype.itemsize + t2.dtype.itemsize)
        vmem_limit = max(2 * tile_bytes + (2 << 20), 32 << 20)

        partials = pl.pallas_call(
            kernel,
            out_shape=jax.ShapeDtypeStruct((g_par * 8, LANES), jnp.float32),
            grid_spec=pltpu.PrefetchScalarGridSpec(
                num_scalar_prefetch=0,
                grid=(g_par, g_red),
                in_specs=[
                    pl.BlockSpec((block_rows, LANES), in_map),
                    pl.BlockSpec((block_rows, LANES), in_map),
                ],
                out_specs=pl.BlockSpec((8, LANES), lambda c, i: (c, 0)),
                scratch_shapes=[pltpu.VMEM((8, LANES), jnp.float32)],
            ),
            compiler_params=pltpu.CompilerParams(
                dimension_semantics=("parallel", "arbitrary"),
                vmem_limit_bytes=int(vmem_limit),
            ),
            cost_estimate=pl.CostEstimate(
                flops=12 * n_main,
                transcendentals=(1 if binary_targets else 3) * n_main,
                bytes_accessed=int(n_main * (x2.dtype.itemsize + t2.dtype.itemsize)
                                   + 4 * g_par * 8 * LANES)),
        )(x2, t2)

        total = total + jnp.sum(partials, dtype=jnp.float32)

    if n_main < n:
        # Remainder (< 1024 elements): plain jnp, no whole-array pad/copy.
        tail = _focal_terms(x[n_main:], t[n_main:], binary_targets)
        total = total + jnp.sum(tail, dtype=jnp.float32)

    return total / jnp.float32(n)


def _focal_loss_ref(inputs, targets):
    p = inputs.astype(jnp.float32)
    t = targets.astype(jnp.float32)
    log_p = jnp.maximum(jnp.log(p), -100.0)
    log_1mp = jnp.maximum(jnp.log(1.0 - p), -100.0)
    bce = -(t * log_p + (1.0 - t) * log_1mp)
    pt = jnp.exp(-bce)
    return jnp.mean(ALPHA * (1.0 - pt) ** GAMMA * bce)


if __name__ == "__main__":
    key = jax.random.PRNGKey(0)
    k1, k2 = jax.random.split(key)

    # Attacker-model-like shape: batch=32, 128 probability outputs each.
    shape = (32, 128)
    probs = jax.nn.sigmoid(jax.random.normal(k1, shape, dtype=jnp.float32))
    labels = (jax.random.uniform(k2, shape) > 0.5).astype(jnp.float32)

    loss = focal_loss(probs, labels)
    jax.block_until_ready(loss)
    ref = _focal_loss_ref(probs, labels)
    assert jnp.allclose(loss, ref, rtol=1e-5, atol=1e-6), (loss, ref)

    # bf16 inputs go to the kernel natively (cast to f32 in-kernel).
    probs_bf16 = probs.astype(jnp.bfloat16)
    loss_bf16 = focal_loss(probs_bf16, labels)
    jax.block_until_ready(loss_bf16)
    ref_bf16 = _focal_loss_ref(probs_bf16.astype(jnp.float32), labels)
    assert jnp.allclose(loss_bf16, ref_bf16, rtol=1e-5, atol=1e-6)

    # Optional binary-target fast path (1 transcendental / element).
    loss_bin = focal_loss(probs, labels, binary_targets=True)
    jax.block_until_ready(loss_bin)
    assert jnp.allclose(loss_bin, ref, rtol=1e-4, atol=1e-6), (loss_bin, ref)

    # Unaligned size: 1024-aligned prefix through the kernel, tail in jnp.
    shape2 = (33, 100)            # 3300 elems -> 3072 via kernel + 228 tail
    p2 = jax.nn.sigmoid(jax.random.normal(k1, shape2, dtype=jnp.float32))
    t2 = (jax.random.uniform(k2, shape2) > 0.5).astype(jnp.float32)
    loss2 = focal_loss(p2, t2)
    jax.block_until_ready(loss2)
    assert jnp.allclose(loss2, _focal_loss_ref(p2, t2), rtol=1e-5, atol=1e-6)

    # Tiny input (< 1024 elements): handled entirely by the jnp fallback.
    shape3 = (7, 33)
    p3 = jax.nn.sigmoid(jax.random.normal(k1, shape3, dtype=jnp.float32))
    t3 = (jax.random.uniform(k2, shape3) > 0.5).astype(jnp.float32)
    loss3 = focal_loss(p3, t3)
    jax.block_until_ready(loss3)
    assert jnp.allclose(loss3, _focal_loss_ref(p3, t3), rtol=1e-5, atol=1e-6)

    print("KERNEL_OK")
</pallas_src>

<mosaic_0001>
module attributes {stable_mosaic.version = 11 : i64} {
  func.func @_focal_sum_kernel(%arg0: i32, %arg1: i32, %arg2: memref<32x128xf32, #tpu.memory_space<vmem>>, %arg3: memref<32x128xf32, #tpu.memory_space<vmem>>, %arg4: memref<8x128xf32, #tpu.memory_space<vmem>>, %arg5: memref<8x128xf32, #tpu.memory_space<vmem>>) attributes {dimension_semantics = [#tpu.dimension_semantics<parallel>, #tpu.dimension_semantics<arbitrary>], iteration_bounds = array<i64: 1, 1>, scalar_prefetch = 0 : i64, scratch_operands = 1 : i64, tpu.core_type = #tpu.core_type<tc>, window_params = [{transform_indices = @transform_0, window_bounds = array<i64: 32, 128>}, {transform_indices = @transform_1, window_bounds = array<i64: 32, 128>}, {transform_indices = @transform_2, window_bounds = array<i64: 8, 128>}]} {
    %c0_i32 = arith.constant 0 : i32
    %0 = arith.cmpi eq, %arg1, %c0_i32 : i32
    %1 = arith.extui %0 : i1 to i32
    %c0_i32_0 = arith.constant 0 : i32
    %2 = arith.cmpi ne, %1, %c0_i32_0 : i32
    scf.if %2 {
      %cst = arith.constant 0.000000e+00 : f32
      %16 = vector.broadcast %cst : f32 to vector<8x128xf32>
      %c0 = arith.constant 0 : index
      %c0_7 = arith.constant 0 : index
      %17 = vector.load %arg5[%c0, %c0_7] : memref<8x128xf32, #tpu.memory_space<vmem>>, vector<8x128xf32>
      tpu.vector_store %arg5[%c0, %c0_7], %16 {strides = array<i32>} : memref<8x128xf32, #tpu.memory_space<vmem>>, vector<8x128xf32>,
    } else {
    }
    %c1_i32 = arith.constant 1 : i32
    %3 = arith.muli %arg0, %c1_i32 : i32
    %4 = arith.addi %3, %arg1 : i32
    %c32_i32 = arith.constant 32 : i32
    %5 = arith.muli %4, %c32_i32 : i32
    %c32_i32_1 = arith.constant 32 : i32
    %6 = arith.addi %5, %c32_i32_1 : i32
    %c32_i32_2 = arith.constant 32 : i32
    %7 = arith.cmpi sle, %6, %c32_i32_2 : i32
    %8 = arith.extui %7 : i1 to i32
    %c0_i32_3 = arith.constant 0 : i32
    %9 = arith.cmpi ne, %8, %c0_i32_3 : i32
    scf.if %9 {
      %c0 = arith.constant 0 : index
      %c0_7 = arith.constant 0 : index
      %16 = vector.load %arg2[%c0, %c0_7] : memref<32x128xf32, #tpu.memory_space<vmem>>, vector<32x128xf32>
      %c0_8 = arith.constant 0 : index
      %c0_9 = arith.constant 0 : index
      %17 = vector.load %arg3[%c0_8, %c0_9] : memref<32x128xf32, #tpu.memory_space<vmem>>, vector<32x128xf32>
      %18 = math.log %16 : vector<32x128xf32>
      %cst = arith.constant -1.000000e+02 : f32
      %19 = vector.broadcast %cst : f32 to vector<32x128xf32>
      %20 = arith.maximumf %18, %19 : vector<32x128xf32>
      %cst_10 = arith.constant 1.000000e+00 : f32
      %21 = vector.broadcast %cst_10 : f32 to vector<32x128xf32>
      %22 = arith.subf %21, %16 : vector<32x128xf32>
      %23 = math.log %22 : vector<32x128xf32>
      %cst_11 = arith.constant -1.000000e+02 : f32
      %24 = vector.broadcast %cst_11 : f32 to vector<32x128xf32>
      %25 = arith.maximumf %23, %24 : vector<32x128xf32>
      %26 = arith.mulf %17, %20 : vector<32x128xf32>
      %cst_12 = arith.constant 1.000000e+00 : f32
      %27 = vector.broadcast %cst_12 : f32 to vector<32x128xf32>
      %28 = arith.subf %27, %17 : vector<32x128xf32>
      %29 = arith.mulf %28, %25 : vector<32x128xf32>
      %30 = arith.addf %26, %29 : vector<32x128xf32>
      %cst_13 = arith.constant 0.000000e+00 : f32
      %31 = vector.broadcast %cst_13 : f32 to vector<32x128xf32>
      %32 = arith.subf %31, %30 : vector<32x128xf32>
      %cst_14 = arith.constant 0.000000e+00 : f32
      %33 = vector.broadcast %cst_14 : f32 to vector<32x128xf32>
      %34 = arith.subf %33, %32 : vector<32x128xf32>
      %35 = math.exp %34 : vector<32x128xf32>
      %cst_15 = arith.constant 1.000000e+00 : f32
      %36 = vector.broadcast %cst_15 : f32 to vector<32x128xf32>
      %37 = arith.subf %36, %35 : vector<32x128xf32>
      %38 = arith.mulf %37, %37 : vector<32x128xf32>
      %39 = arith.mulf %38, %32 : vector<32x128xf32>
      %c0_16 = arith.constant 0 : index
      %c0_17 = arith.constant 0 : index
      %40 = vector.load %arg5[%c0_16, %c0_17] : memref<8x128xf32, #tpu.memory_space<vmem>>, vector<8x128xf32>
      %41 = vector.shape_cast %39 : vector<32x128xf32> to vector<4x8x128xf32>
      %cst_18 = arith.constant dense<0.000000e+00> : vector<8x128xf32>
      %42 = vector.multi_reduction <add>, %41, %cst_18 [0] : vector<4x8x128xf32> to vector<8x128xf32>
      %43 = arith.addf %40, %42 : vector<8x128xf32>
      %c0_19 = arith.constant 0 : index
      %c0_20 = arith.constant 0 : index
      %44 = vector.load %arg5[%c0_19, %c0_20] : memref<8x128xf32, #tpu.memory_space<vmem>>, vector<8x128xf32>
      tpu.vector_store %arg5[%c0_19, %c0_20], %43 {strides = array<i32>} : memref<8x128xf32, #tpu.memory_space<vmem>>, vector<8x128xf32>,
    } else {
    }
    %true = arith.constant true
    %10 = arith.xori %7, %true : i1
    %11 = arith.extui %10 : i1 to i32
    %c0_i32_4 = arith.constant 0 : i32
    %12 = arith.cmpi ne, %11, %c0_i32_4 : i32
    scf.if %12 {
      %16 = tpu.iota {dimensions = array<i32: 0>} : vector<32x128xi32>
      %17 = vector.broadcast %5 : i32 to vector<32x128xi32>
      %18 = arith.addi %17, %16 : vector<32x128xi32>
      %c32_i32_7 = arith.constant 32 : i32
      %19 = vector.broadcast %c32_i32_7 : i32 to vector<32x128xi32>
      %20 = arith.cmpi slt, %18, %19 : vector<32x128xi32>
      %c0 = arith.constant 0 : index
      %c0_8 = arith.constant 0 : index
      %21 = vector.load %arg2[%c0, %c0_8] : memref<32x128xf32, #tpu.memory_space<vmem>>, vector<32x128xf32>
      %cst = arith.constant 1.000000e+00 : f32
      %22 = vector.broadcast %cst : f32 to vector<32x128xf32>
      %23 = arith.select %20, %21, %22 : vector<32x128xi1>, vector<32x128xf32>
      %c0_9 = arith.constant 0 : index
      %c0_10 = arith.constant 0 : index
      %24 = vector.load %arg3[%c0_9, %c0_10] : memref<32x128xf32, #tpu.memory_space<vmem>>, vector<32x128xf32>
      %cst_11 = arith.constant 1.000000e+00 : f32
      %25 = vector.broadcast %cst_11 : f32 to vector<32x128xf32>
      %26 = arith.select %20, %24, %25 : vector<32x128xi1>, vector<32x128xf32>
      %27 = math.log %23 : vector<32x128xf32>
      %cst_12 = arith.constant -1.000000e+02 : f32
      %28 = vector.broadcast %cst_12 : f32 to vector<32x128xf32>
      %29 = arith.maximumf %27, %28 : vector<32x128xf32>
      %cst_13 = arith.constant 1.000000e+00 : f32
      %30 = vector.broadcast %cst_13 : f32 to vector<32x128xf32>
      %31 = arith.subf %30, %23 : vector<32x128xf32>
      %32 = math.log %31 : vector<32x128xf32>
      %cst_14 = arith.constant -1.000000e+02 : f32
      %33 = vector.broadcast %cst_14 : f32 to vector<32x128xf32>
      %34 = arith.maximumf %32, %33 : vector<32x128xf32>
      %35 = arith.mulf %26, %29 : vector<32x128xf32>
      %cst_15 = arith.constant 1.000000e+00 : f32
      %36 = vector.broadcast %cst_15 : f32 to vector<32x128xf32>
      %37 = arith.subf %36, %26 : vector<32x128xf32>
      %38 = arith.mulf %37, %34 : vector<32x128xf32>
      %39 = arith.addf %35, %38 : vector<32x128xf32>
      %cst_16 = arith.constant 0.000000e+00 : f32
      %40 = vector.broadcast %cst_16 : f32 to vector<32x128xf32>
      %41 = arith.subf %40, %39 : vector<32x128xf32>
      %cst_17 = arith.constant 0.000000e+00 : f32
      %42 = vector.broadcast %cst_17 : f32 to vector<32x128xf32>
      %43 = arith.subf %42, %41 : vector<32x128xf32>
      %44 = math.exp %43 : vector<32x128xf32>
      %cst_18 = arith.constant 1.000000e+00 : f32
      %45 = vector.broadcast %cst_18 : f32 to vector<32x128xf32>
      %46 = arith.subf %45, %44 : vector<32x128xf32>
      %47 = arith.mulf %46, %46 : vector<32x128xf32>
      %48 = arith.mulf %47, %41 : vector<32x128xf32>
      %c0_19 = arith.constant 0 : index
      %c0_20 = arith.constant 0 : index
      %49 = vector.load %arg5[%c0_19, %c0_20] : memref<8x128xf32, #tpu.memory_space<vmem>>, vector<8x128xf32>
      %50 = vector.shape_cast %48 : vector<32x128xf32> to vector<4x8x128xf32>
      %cst_21 = arith.constant dense<0.000000e+00> : vector<8x128xf32>
      %51 = vector.multi_reduction <add>, %50, %cst_21 [0] : vector<4x8x128xf32> to vector<8x128xf32>
      %52 = arith.addf %49, %51 : vector<8x128xf32>
      %c0_22 = arith.constant 0 : index
      %c0_23 = arith.constant 0 : index
      %53 = vector.load %arg5[%c0_22, %c0_23] : memref<8x128xf32, #tpu.memory_space<vmem>>, vector<8x128xf32>
      tpu.vector_store %arg5[%c0_22, %c0_23], %52 {strides = array<i32>} : memref<8x128xf32, #tpu.memory_space<vmem>>, vector<8x128xf32>,
    } else {
    }
    %c0_i32_5 = arith.constant 0 : i32
    %13 = arith.cmpi eq, %arg1, %c0_i32_5 : i32
    %14 = arith.extui %13 : i1 to i32
    %c0_i32_6 = arith.constant 0 : i32
    %15 = arith.cmpi ne, %14, %c0_i32_6 : i32
    scf.if %15 {
      %c0 = arith.constant 0 : index
      %c0_7 = arith.constant 0 : index
      %16 = vector.load %arg5[%c0, %c0_7] : memref<8x128xf32, #tpu.memory_space<vmem>>, vector<8x128xf32>
      %c0_8 = arith.constant 0 : index
      %c0_9 = arith.constant 0 : index
      %17 = vector.load %arg4[%c0_8, %c0_9] : memref<8x128xf32, #tpu.memory_space<vmem>>, vector<8x128xf32>
      tpu.vector_store %arg4[%c0_8, %c0_9], %16 {strides = array<i32>} : memref<8x128xf32, #tpu.memory_space<vmem>>, vector<8x128xf32>,
    } else {
    }
    return
  }
  func.func @transform_0(%arg0: i32, %arg1: i32) -> (i32, i32) {
    %c1_i32 = arith.constant 1 : i32
    %0 = arith.muli %arg0, %c1_i32 : i32
    %1 = arith.addi %0, %arg1 : i32
    %c0_i32 = arith.constant 0 : i32
    %2 = arith.minsi %1, %c0_i32 : i32
    %c0_i32_0 = arith.constant 0 : i32
    %c0_i32_1 = arith.constant 0 : i32
    return %2, %c0_i32_0 : i32, i32
  }
  func.func @transform_1(%arg0: i32, %arg1: i32) -> (i32, i32) {
    %c1_i32 = arith.constant 1 : i32
    %0 = arith.muli %arg0, %c1_i32 : i32
    %1 = arith.addi %0, %arg1 : i32
    %c0_i32 = arith.constant 0 : i32
    %2 = arith.minsi %1, %c0_i32 : i32
    %c0_i32_0 = arith.constant 0 : i32
    %c0_i32_1 = arith.constant 0 : i32
    return %2, %c0_i32_0 : i32, i32
  }
  func.func @transform_2(%arg0: i32, %arg1: i32) -> (i32, i32) {
    %c0_i32 = arith.constant 0 : i32
    %c0_i32_0 = arith.constant 0 : i32
    return %arg0, %c0_i32 : i32, i32
  }
}

</mosaic_0001>

<bundles_post_ra>
// kernel: focal_loss.1
= control target key start
LH: loop header
LB: loop body
LE: loop exit
PB: predicated region body
PF: predicated region fallthrough
CT: control target
= control target key end

     0   :  { %7 = vsyncpa [#allocation4], 0  ;;  %s396_s0 = inlined_call_operand.hbm [shape: f32[32,128], index: 0, kind: input, shape index: {}]   ;;  %s397_s1 = inlined_call_operand.hbm [shape: f32[32,128], index: 1, kind: input, shape index: {}]   ;;  %s398_s2 = inlined_call_operand.vmem [shape: f32[8,128], index: 2, kind: output, shape index: {}]  }
   0x1   :  { %s19_s11 = sshll.u32 %s396_s0, 4  ;;  %s20_s11 = int_to_ptr.hbm [resolvable:$true] %s19_s11 }
   0x2   :  { %8 = vsyncpa [#allocation6], 0  ;;  %s368_s12 = smov [#allocation3]   ;;  %s38_s16 = sshll.u32 %s397_s1, 4  ;;  %s39_s16 = int_to_ptr.hbm [resolvable:$true] %s38_s16 }
   0x3   :  { %s21_s13 = sshll.u32 %s368_s12, 4  ;;  %s369_s17 = smov 128   ;;  %s22_s13 = int_to_ptr.vmem [resolvable:$true] %s21_s13 }
   0x4   :  { %s370_s18 = smov 8   ;;  %s371_s19 = smov [#allocation5]  }
   0x5   :  { %27 = dma.hbm_to_vmem [thread:$0]  %s20_s11, 512, %s22_s13, [#allocation4], %s369_s17, %s369_s17, %s370_s18  }
   0x6   :  { %s40_s20 = sshll.u32 %s371_s19, 4  ;;  %s41_s20 = int_to_ptr.vmem [resolvable:$true] %s40_s20 }
   0x7   :  { %46 = dma.hbm_to_vmem [thread:$0]  %s39_s16, 512, %s41_s20, [#allocation6], %s369_s17, %s369_s17, %s370_s18  }
   0x8   :  { %364 = dma.done.wait [#allocation4], 512  }
   0x9   :  { %365 = vsyncadd [#allocation4], 4294966784 }
   0xa   :  { %366 = dma.done.wait [#allocation6], 512  }
   0xb   :  { %367 = vsyncadd [#allocation6], 4294966784  ;;  %v75_v0 = vld [vmem:[#allocation3] sm:$0xff]  ;;  %v76_v1 = vld [vmem:[#allocation3 + $0x8] sm:$0xff] }
   0xc   :  { %v77_v2 = vld [vmem:[#allocation3 + $0x10] sm:$0xff]  ;;  %v78_v3 = vld [vmem:[#allocation3 + $0x18] sm:$0xff]  ;;  %292 = vlog2.f32 %v75_v0  ;;  %v95_v4 = vsub.f32 1.0, %v75_v0  ;;  %v96_v5 = vsub.f32 1.0, %v76_v1  ;;  %v79_v12 = vld [vmem:[#allocation5] sm:$0xff] }
   0xd   :  { %294 = vlog2.f32 %v76_v1  ;;  %v97_v6 = vsub.f32 1.0, %v77_v2  ;;  %v98_v7 = vsub.f32 1.0, %v78_v3  ;;  %v80_v15 = vld [vmem:[#allocation5 + $0x8] sm:$0xff]  ;;  %v81_v19 = vld [vmem:[#allocation5 + $0x10] sm:$0xff]  ;;  %v82_v23 = vld [vmem:[#allocation5 + $0x18] sm:$0xff]  ;;  %v115_v26 = vsub.f32 1.0, %v79_v12 }
   0xe   :  { %296 = vlog2.f32 %v77_v2  ;;  %v116_v30 = vsub.f32 1.0, %v80_v15  ;;  %v117_v35 = vsub.f32 1.0, %v81_v19  ;;  %v118_v39 = vsub.f32 1.0, %v82_v23 }
   0xf   :  { %298 = vlog2.f32 %v78_v3 }
  0x10   :  { %300 = vlog2.f32 %v95_v4 }
  0x11   :  { %302 = vlog2.f32 %v96_v5 }
  0x12   :  { %v293_v8 = vpop.eup %292  ;;  %304 = vlog2.f32 %v97_v6 }
  0x13   :  { %v295_v9 = vpop.eup %294  ;;  %v84_v10 = vmul.f32 0.6931472, %v293_v8  ;;  %306 = vlog2.f32 %v98_v7 }
  0x14   :  { %v297_v11 = vpop.eup %296  ;;  %v86_v13 = vmul.f32 0.6931472, %v295_v9 }
  0x15   :  { %v299_v14 = vpop.eup %298  ;;  %v88_v16 = vmul.f32 0.6931472, %v297_v11  ;;  %v91_v17 = vmax.f32 %v84_v10, -100.0 }
  0x16   :  { %v301_v18 = vpop.eup %300  ;;  %v90_v20 = vmul.f32 0.6931472, %v299_v14  ;;  %v92_v21 = vmax.f32 %v86_v13, -100.0 }
  0x17   :  { %v303_v22 = vpop.eup %302  ;;  %v93_v24 = vmax.f32 %v88_v16, -100.0  ;;  %v100_v25 = vmul.f32 0.6931472, %v301_v18  ;;  %v111_v34 = vmul.f32 %v91_v17, %v79_v12 }
  0x18   :  { %v305_v27 = vpop.eup %304  ;;  %v94_v28 = vmax.f32 %v90_v20, -100.0  ;;  %v102_v29 = vmul.f32 0.6931472, %v303_v22  ;;  %v112_v38 = vmul.f32 %v92_v21, %v80_v15 }
  0x19   :  { %v307_v31 = vpop.eup %306  ;;  %v104_v32 = vmul.f32 0.6931472, %v305_v27  ;;  %v107_v33 = vmax.f32 %v100_v25, -100.0  ;;  %v113_v41 = vmul.f32 %v93_v24, %v81_v19 }
  0x1a   :  { %v106_v36 = vmul.f32 0.6931472, %v307_v31  ;;  %v108_v37 = vmax.f32 %v102_v29, -100.0  ;;  %v114_v44 = vmul.f32 %v94_v28, %v82_v23 }
  0x1b   :  { %v109_v40 = vmax.f32 %v104_v32, -100.0  ;;  %v119_v42 = vmul.f32 %v115_v26, %v107_v33 }
  0x1c   :  { %v110_v43 = vmax.f32 %v106_v36, -100.0  ;;  %v120_v45 = vmul.f32 %v116_v30, %v108_v37 }
  0x1d   :  { %v121_v46 = vmul.f32 %v117_v35, %v109_v40  ;;  %v123_v47 = vadd.f32 %v119_v42, %v111_v34 }
  0x1e   :  { %v122_v48 = vmul.f32 %v118_v39, %v110_v43  ;;  %v124_v49 = vadd.f32 %v120_v45, %v112_v38 }
  0x1f   :  { %v125_v50 = vadd.f32 %v121_v46, %v113_v41  ;;  %v127_v51 = vsub.f32 0.0, %v123_v47 }
  0x20   :  { %v126_v52 = vadd.f32 %v122_v48, %v114_v44  ;;  %v128_v53 = vsub.f32 0.0, %v124_v49 }
  0x21   :  { %v129_v54 = vsub.f32 0.0, %v125_v50  ;;  %v131_v55 = vsub.f32 0.0, %v127_v51 }
  0x22   :  { %v130_v56 = vsub.f32 0.0, %v126_v52  ;;  %v132_v57 = vsub.f32 0.0, %v128_v53 }
  0x23   :  { %v133_v58 = vsub.f32 0.0, %v129_v54  ;;  %v135_v59 = vmul.f32 1.442695, %v131_v55 }
  0x24   :  { %v134_v60 = vsub.f32 0.0, %v130_v56  ;;  %v137_v61 = vmul.f32 1.442695, %v132_v57 }
  0x25   :  { %308 = vpow2.f32 %v135_v59  ;;  %v139_v62 = vmul.f32 1.442695, %v133_v58 }
  0x26   :  { %310 = vpow2.f32 %v137_v61  ;;  %v141_v63 = vmul.f32 1.442695, %v134_v60 }
  0x27   :  { %312 = vpow2.f32 %v139_v62 }
  0x28   :  { %314 = vpow2.f32 %v141_v63 }
  0x2b   :  { %v309_v0 = vpop.eup %308 }
  0x2c   :  { %v311_v1 = vpop.eup %310  ;;  %v143_v2 = vsub.f32 1.0, %v309_v0 }
  0x2d   :  { %v313_v3 = vpop.eup %312  ;;  %v144_v4 = vsub.f32 1.0, %v311_v1 }
  0x2e   :  { %v315_v5 = vpop.eup %314  ;;  %v145_v6 = vsub.f32 1.0, %v313_v3  ;;  %v147_v7 = vmul.f32 %v143_v2, %v143_v2 }
  0x2f   :  { %v146_v8 = vsub.f32 1.0, %v315_v5  ;;  %v148_v9 = vmul.f32 %v144_v4, %v144_v4 }
  0x30   :  { %v149_v10 = vmul.f32 %v145_v6, %v145_v6  ;;  %v151_v11 = vmul.f32 %v147_v7, %v127_v51 }
  0x31   :  { %v150_v12 = vmul.f32 %v146_v8, %v146_v8  ;;  %v152_v13 = vmul.f32 %v148_v9, %v128_v53 }
  0x32   :  { %v153_v14 = vmul.f32 %v149_v10, %v129_v54 }
  0x33   :  { %v154_v15 = vmul.f32 %v150_v12, %v130_v56  ;;  %v156_v16 = vadd.f32 %v152_v13, %v151_v11 }
  0x35   :  { %v157_v17 = vadd.f32 %v156_v16, %v153_v14 }
  0x37   :  { %v158_v18 = vadd.f32 %v157_v17, %v154_v15 }
  0x39   :  { %277 = vst [vmem:[%s398_s2] sm:$0xff] %v158_v18 }
  0x3a   :  { %282 = vsyncpa [#allocation4], 1 }
  0x3b   :  { %283 = vsyncpa [#allocation6], 1 }

</bundles_post_ra>
